<compile_context>
chip_gen: v6e
topology: v6e:2x2x1
jax: 0.10.0
libtpu: 0.0.40
codegen_flags: <defaults>
</compile_context>

<pallas_src>
import functools
import math

import jax
import jax.numpy as jnp
from jax import lax
from jax.experimental import pallas as pl
from jax.experimental.pallas import tpu as pltpu


def _angular_loss_kernel(lab_ref, wf_ref, out_ref, m_scr, l_scr, t_scr,
                         *, s, m, eps, loss_type, c_total, tc):
    k = pl.program_id(1)

    @pl.when(k == 0)
    def _init():
        m_scr[...] = jnp.full_like(m_scr, -jnp.inf)
        l_scr[...] = jnp.zeros_like(l_scr)
        t_scr[...] = jnp.zeros_like(t_scr)

    wf = wf_ref[...].astype(jnp.float32)          # bf16/f32 tile -> f32 in-kernel
    labels = lab_ref[...]                         # (TN, 1) int32
    tn, tc_blk = wf.shape

    # global class index of each lane in this C tile
    col = lax.broadcasted_iota(jnp.int32, (tn, tc_blk), 1) + k * tc
    onehot = col == labels                        # exactly one True per row, globally

    # target cosine gather: only the C tile containing labels[i] contributes
    t_scr[...] += jnp.sum(jnp.where(onehot, wf, 0.0), axis=1, keepdims=True)

    logits = s * wf
    if c_total % tc != 0:
        # mask out-of-range padded lanes of the final (partial) C tile
        logits = jnp.where(col < c_total, logits, -jnp.inf)

    # flash-style running (max, sum of exp) over ALL classes (1 exp per element)
    m_new = jnp.maximum(m_scr[...], jnp.max(logits, axis=1, keepdims=True))
    l_scr[...] = (l_scr[...] * jnp.exp(m_scr[...] - m_new)
                  + jnp.sum(jnp.exp(logits - m_new), axis=1, keepdims=True))
    m_scr[...] = m_new

    @pl.when(k == pl.num_programs(1) - 1)
    def _finalize():
        t = t_scr[...]
        if loss_type == "cosface":
            numerator = s * (t - m)
        elif loss_type == "arcface":
            tcl = jnp.clip(t, -1.0 + eps, 1.0 - eps)
            # cos(acos(t) + m) = t*cos(m) - sqrt(1 - t^2)*sin(m)  (exact; avoids arccos)
            numerator = s * (tcl * math.cos(m) - jnp.sqrt(1.0 - tcl * tcl) * math.sin(m))
        else:  # sphereface
            tcl = jnp.clip(t, -1.0 + eps, 1.0 - eps)
            # TODO(synk): relies on jnp.arccos lowering in Mosaic; arcface/cosface avoid it.
            numerator = s * jnp.cos(m * jnp.arccos(tcl))

        mx = m_scr[...]
        # sum_{j != y} exp(s*wf_j) = exp(mx) * l_excl   (excl by subtraction, no 2nd reduce)
        l_excl = l_scr[...] - jnp.exp(s * t - mx)
        # L = numerator - log(exp(numerator) + exp(mx) * l_excl), computed stably
        big = jnp.maximum(numerator, mx)
        log_den = big + jnp.log(jnp.exp(numerator - big) + jnp.exp(mx - big) * l_excl)
        out_ref[...] = numerator - log_den        # per-row log-likelihood term


def angular_penalty_sm_loss(wf, labels, loss_type="arcface", eps=1e-7, s=None, m=None,
                            block_n=128, block_c=2048):
    loss_type = loss_type.lower()
    assert loss_type in ("arcface", "sphereface", "cosface", "crossentropy")
    if loss_type == "arcface":
        s = 64.0 if s is None else s
        m = 0.5 if m is None else m
    elif loss_type == "sphereface":
        s = 64.0 if s is None else s
        m = 1.35 if m is None else m
    elif loss_type == "cosface":
        s = 30.0 if s is None else s
        m = 0.35 if m is None else m
    else:  # crossentropy == cosface math with s=1, m=0 (softmax cross entropy)
        s, m, loss_type = 1.0, 0.0, "cosface"

    n, c = wf.shape
    labels2d = labels.astype(jnp.int32).reshape(n, 1)

    # Lane-dense tiles: full dim if it fits, else (mult of 8, mult of 128) blocks.
    tn = n if n <= block_n else block_n
    tc = c if c <= block_c else block_c
    grid = (pl.cdiv(n, tn), pl.cdiv(c, tc))

    kernel = functools.partial(
        _angular_loss_kernel, s=float(s), m=float(m), eps=float(eps),
        loss_type=loss_type, c_total=c, tc=tc)

    itemsize = jnp.dtype(wf.dtype).itemsize
    # double-buffered wf tile dominates VMEM; keep a floor/cap safe for v5e..v7x
    vmem_limit = int(min(max(6 * tn * tc * itemsize + (4 << 20), 32 << 20), 64 << 20))
    cost = pl.CostEstimate(flops=6 * n * c,
                           transcendentals=n * c,
                           bytes_accessed=n * c * itemsize + 8 * n)

    row_loss = pl.pallas_call(
        kernel,
        out_shape=jax.ShapeDtypeStruct((n, 1), jnp.float32),
        grid_spec=pltpu.PrefetchScalarGridSpec(
            num_scalar_prefetch=0,
            grid=grid,
            in_specs=[
                pl.BlockSpec((tn, 1), lambda i, k: (i, 0)),    # labels column
                pl.BlockSpec((tn, tc), lambda i, k: (i, k)),   # wf tiles (pipelined)
            ],
            out_specs=pl.BlockSpec((tn, 1), lambda i, k: (i, 0)),
            scratch_shapes=[pltpu.VMEM((tn, 1), jnp.float32)] * 3,  # max, sum, target
        ),
        compiler_params=pltpu.CompilerParams(
            dimension_semantics=("parallel", "arbitrary"),
            vmem_limit_bytes=vmem_limit,
        ),
        cost_estimate=cost,
    )(labels2d, wf)

    # tiny O(N) epilogue; keeps the N grid axis parallel-safe on megacore
    return -jnp.mean(row_loss)


def _reference_loss(wf, labels, loss_type, s, m, eps=1e-7):
    """Pure-JAX reference matching the PyTorch module's forward."""
    wf = wf.astype(jnp.float32)
    rows = jnp.arange(wf.shape[0])
    if loss_type == "crossentropy":
        return -jnp.mean(jax.nn.log_softmax(wf, axis=-1)[rows, labels])
    tgt = wf[rows, labels]
    if loss_type == "cosface":
        numerator = s * (tgt - m)
    elif loss_type == "arcface":
        numerator = s * jnp.cos(jnp.arccos(jnp.clip(tgt, -1.0 + eps, 1.0 - eps)) + m)
    else:  # sphereface
        numerator = s * jnp.cos(m * jnp.arccos(jnp.clip(tgt, -1.0 + eps, 1.0 - eps)))
    mask = jax.nn.one_hot(labels, wf.shape[1], dtype=bool)
    excl = jnp.sum(jnp.where(mask, 0.0, jnp.exp(s * wf)), axis=1)
    L = numerator - jnp.log(jnp.exp(numerator) + excl)
    return -jnp.mean(L)


if __name__ == "__main__":
    key = jax.random.PRNGKey(0)
    k1, k2 = jax.random.split(key)

    N, C = 16, 384  # wf = cosine-similarity logits in (-1, 1), labels in [0, C)
    wf = jax.random.uniform(k1, (N, C), minval=-0.99, maxval=0.99, dtype=jnp.float32)
    labels = jax.random.randint(k2, (N,), 0, C, dtype=jnp.int32)

    checks = []

    # 1) arcface, default blocking (single C tile)
    out = jax.block_until_ready(angular_penalty_sm_loss(wf, labels, "arcface"))
    ref = _reference_loss(wf, labels, "arcface", 64.0, 0.5)
    checks.append(("arcface/f32", out, ref))

    # 2) arcface, forced multi-tile grid with a partial final C tile (exercises
    #    the C-axis accumulator, iota offset, and padding mask)
    out = jax.block_until_ready(
        angular_penalty_sm_loss(wf, labels, "arcface", block_n=8, block_c=256))
    checks.append(("arcface/tiled", out, ref))

    # 3) cosface
    out = jax.block_until_ready(angular_penalty_sm_loss(wf, labels, "cosface"))
    checks.append(("cosface", out, _reference_loss(wf, labels, "cosface", 30.0, 0.35)))

    # 4) crossentropy branch of the module
    out = jax.block_until_ready(angular_penalty_sm_loss(wf, labels, "crossentropy"))
    checks.append(("crossentropy", out,
                   _reference_loss(wf, labels, "crossentropy", 1.0, 0.0)))

    # 5) bf16 ingest (upcast happens inside the kernel, no wrapper astype)
    wf_bf16 = wf.astype(jnp.bfloat16)
    out = jax.block_until_ready(angular_penalty_sm_loss(wf_bf16, labels, "arcface"))
    checks.append(("arcface/bf16", out,
                   _reference_loss(wf_bf16.astype(jnp.float32), labels, "arcface", 64.0, 0.5)))

    for name, got, want in checks:
        assert jnp.isfinite(got), (name, got)
        assert jnp.allclose(got, want, rtol=1e-4, atol=1e-4), (name, got, want)

    print("KERNEL_OK")
</pallas_src>

<mosaic_0001>
module attributes {stable_mosaic.version = 11 : i64} {
  func.func @_angular_loss_kernel(%arg0: i32, %arg1: i32, %arg2: memref<16x1xi32, #tpu.memory_space<vmem>>, %arg3: memref<16x384xf32, #tpu.memory_space<vmem>>, %arg4: memref<16x1xf32, #tpu.memory_space<vmem>>, %arg5: memref<16x1xf32, #tpu.memory_space<vmem>>, %arg6: memref<16x1xf32, #tpu.memory_space<vmem>>, %arg7: memref<16x1xf32, #tpu.memory_space<vmem>>) attributes {dimension_semantics = [#tpu.dimension_semantics<parallel>, #tpu.dimension_semantics<arbitrary>], iteration_bounds = array<i64: 1, 1>, scalar_prefetch = 0 : i64, scratch_operands = 3 : i64, tpu.core_type = #tpu.core_type<tc>, window_params = [{transform_indices = @transform_0, window_bounds = array<i64: 16, 1>}, {transform_indices = @transform_1, window_bounds = array<i64: 16, 384>}, {transform_indices = @transform_2, window_bounds = array<i64: 16, 1>}]} {
    %c0_i32 = arith.constant 0 : i32
    %0 = arith.cmpi eq, %arg1, %c0_i32 : i32
    %1 = arith.extui %0 : i1 to i32
    %c0_i32_0 = arith.constant 0 : i32
    %2 = arith.cmpi ne, %1, %c0_i32_0 : i32
    scf.if %2 {
      %cst_24 = arith.constant 0xFF800000 : f32
      %40 = vector.broadcast %cst_24 : f32 to vector<16x1xf32>
      %c0_25 = arith.constant 0 : index
      %c0_26 = arith.constant 0 : index
      %41 = vector.load %arg5[%c0_25, %c0_26] : memref<16x1xf32, #tpu.memory_space<vmem>>, vector<16x1xf32>
      tpu.vector_store %arg5[%c0_25, %c0_26], %40 {strides = array<i32>} : memref<16x1xf32, #tpu.memory_space<vmem>>, vector<16x1xf32>,
      %cst_27 = arith.constant 0.000000e+00 : f32
      %42 = vector.broadcast %cst_27 : f32 to vector<16x1xf32>
      %c0_28 = arith.constant 0 : index
      %c0_29 = arith.constant 0 : index
      %43 = vector.load %arg6[%c0_28, %c0_29] : memref<16x1xf32, #tpu.memory_space<vmem>>, vector<16x1xf32>
      tpu.vector_store %arg6[%c0_28, %c0_29], %42 {strides = array<i32>} : memref<16x1xf32, #tpu.memory_space<vmem>>, vector<16x1xf32>,
      %cst_30 = arith.constant 0.000000e+00 : f32
      %44 = vector.broadcast %cst_30 : f32 to vector<16x1xf32>
      %c0_31 = arith.constant 0 : index
      %c0_32 = arith.constant 0 : index
      %45 = vector.load %arg7[%c0_31, %c0_32] : memref<16x1xf32, #tpu.memory_space<vmem>>, vector<16x1xf32>
      tpu.vector_store %arg7[%c0_31, %c0_32], %44 {strides = array<i32>} : memref<16x1xf32, #tpu.memory_space<vmem>>, vector<16x1xf32>,
    } else {
    }
    %c0 = arith.constant 0 : index
    %c0_1 = arith.constant 0 : index
    %3 = vector.load %arg3[%c0, %c0_1] : memref<16x384xf32, #tpu.memory_space<vmem>>, vector<16x384xf32>
    %c0_2 = arith.constant 0 : index
    %c0_3 = arith.constant 0 : index
    %4 = vector.load %arg2[%c0_2, %c0_3] : memref<16x1xi32, #tpu.memory_space<vmem>>, vector<16x1xi32>
    %5 = tpu.iota {dimensions = array<i32: 1>} : vector<16x384xi32>
    %c384_i32 = arith.constant 384 : i32
    %6 = arith.muli %arg1, %c384_i32 : i32
    %7 = vector.broadcast %6 : i32 to vector<16x384xi32>
    %8 = arith.addi %5, %7 : vector<16x384xi32>
    %9 = vector.broadcast %4 : vector<16x1xi32> to vector<16x384xi32>
    %10 = arith.cmpi eq, %8, %9 : vector<16x384xi32>
    %c0_4 = arith.constant 0 : index
    %c0_5 = arith.constant 0 : index
    %11 = vector.load %arg7[%c0_4, %c0_5] : memref<16x1xf32, #tpu.memory_space<vmem>>, vector<16x1xf32>
    %cst = arith.constant 0.000000e+00 : f32
    %12 = vector.broadcast %cst : f32 to vector<16x384xf32>
    %13 = arith.select %10, %3, %12 : vector<16x384xi1>, vector<16x384xf32>
    %cst_6 = arith.constant dense<0.000000e+00> : vector<16xf32>
    %14 = vector.multi_reduction <add>, %13, %cst_6 [1] : vector<16x384xf32> to vector<16xf32>
    %15 = vector.shape_cast %14 : vector<16xf32> to vector<16x1xf32>
    %16 = arith.addf %11, %15 : vector<16x1xf32>
    %c0_7 = arith.constant 0 : index
    %c0_8 = arith.constant 0 : index
    %17 = vector.load %arg7[%c0_7, %c0_8] : memref<16x1xf32, #tpu.memory_space<vmem>>, vector<16x1xf32>
    tpu.vector_store %arg7[%c0_7, %c0_8], %16 {strides = array<i32>} : memref<16x1xf32, #tpu.memory_space<vmem>>, vector<16x1xf32>,
    %cst_9 = arith.constant 6.400000e+01 : f32
    %18 = vector.broadcast %cst_9 : f32 to vector<16x384xf32>
    %19 = arith.mulf %18, %3 : vector<16x384xf32>
    %c0_10 = arith.constant 0 : index
    %c0_11 = arith.constant 0 : index
    %20 = vector.load %arg5[%c0_10, %c0_11] : memref<16x1xf32, #tpu.memory_space<vmem>>, vector<16x1xf32>
    %cst_12 = arith.constant dense<0xFF800000> : vector<16xf32>
    %21 = vector.multi_reduction <maximumf>, %19, %cst_12 [1] : vector<16x384xf32> to vector<16xf32>
    %22 = vector.shape_cast %21 : vector<16xf32> to vector<16x1xf32>
    %23 = arith.maximumf %20, %22 : vector<16x1xf32>
    %c0_13 = arith.constant 0 : index
    %c0_14 = arith.constant 0 : index
    %24 = vector.load %arg6[%c0_13, %c0_14] : memref<16x1xf32, #tpu.memory_space<vmem>>, vector<16x1xf32>
    %c0_15 = arith.constant 0 : index
    %c0_16 = arith.constant 0 : index
    %25 = vector.load %arg5[%c0_15, %c0_16] : memref<16x1xf32, #tpu.memory_space<vmem>>, vector<16x1xf32>
    %26 = arith.subf %25, %23 : vector<16x1xf32>
    %27 = math.exp %26 : vector<16x1xf32>
    %28 = arith.mulf %24, %27 : vector<16x1xf32>
    %29 = vector.broadcast %23 : vector<16x1xf32> to vector<16x384xf32>
    %30 = arith.subf %19, %29 : vector<16x384xf32>
    %31 = math.exp %30 : vector<16x384xf32>
    %cst_17 = arith.constant dense<0.000000e+00> : vector<16xf32>
    %32 = vector.multi_reduction <add>, %31, %cst_17 [1] : vector<16x384xf32> to vector<16xf32>
    %33 = vector.shape_cast %32 : vector<16xf32> to vector<16x1xf32>
    %34 = arith.addf %28, %33 : vector<16x1xf32>
    %c0_18 = arith.constant 0 : index
    %c0_19 = arith.constant 0 : index
    %35 = vector.load %arg6[%c0_18, %c0_19] : memref<16x1xf32, #tpu.memory_space<vmem>>, vector<16x1xf32>
    tpu.vector_store %arg6[%c0_18, %c0_19], %34 {strides = array<i32>} : memref<16x1xf32, #tpu.memory_space<vmem>>, vector<16x1xf32>,
    %c0_20 = arith.constant 0 : index
    %c0_21 = arith.constant 0 : index
    %36 = vector.load %arg5[%c0_20, %c0_21] : memref<16x1xf32, #tpu.memory_space<vmem>>, vector<16x1xf32>
    tpu.vector_store %arg5[%c0_20, %c0_21], %23 {strides = array<i32>} : memref<16x1xf32, #tpu.memory_space<vmem>>, vector<16x1xf32>,
    %c0_i32_22 = arith.constant 0 : i32
    %37 = arith.cmpi eq, %arg1, %c0_i32_22 : i32
    %38 = arith.extui %37 : i1 to i32
    %c0_i32_23 = arith.constant 0 : i32
    %39 = arith.cmpi ne, %38, %c0_i32_23 : i32
    scf.if %39 {
      %c0_24 = arith.constant 0 : index
      %c0_25 = arith.constant 0 : index
      %40 = vector.load %arg7[%c0_24, %c0_25] : memref<16x1xf32, #tpu.memory_space<vmem>>, vector<16x1xf32>
      %cst_26 = arith.constant -0.99999988 : f32
      %cst_27 = arith.constant 0.99999988 : f32
      %41 = vector.broadcast %cst_26 : f32 to vector<16x1xf32>
      %42 = arith.maximumf %41, %40 : vector<16x1xf32>
      %43 = vector.broadcast %cst_27 : f32 to vector<16x1xf32>
      %44 = arith.minimumf %43, %42 : vector<16x1xf32>
      %cst_28 = arith.constant 0.87758255 : f32
      %45 = vector.broadcast %cst_28 : f32 to vector<16x1xf32>
      %46 = arith.mulf %44, %45 : vector<16x1xf32>
      %47 = arith.mulf %44, %44 : vector<16x1xf32>
      %cst_29 = arith.constant 1.000000e+00 : f32
      %48 = vector.broadcast %cst_29 : f32 to vector<16x1xf32>
      %49 = arith.subf %48, %47 : vector<16x1xf32>
      %50 = math.sqrt %49 : vector<16x1xf32>
      %cst_30 = arith.constant 0.47942555 : f32
      %51 = vector.broadcast %cst_30 : f32 to vector<16x1xf32>
      %52 = arith.mulf %50, %51 : vector<16x1xf32>
      %53 = arith.subf %46, %52 : vector<16x1xf32>
      %cst_31 = arith.constant 6.400000e+01 : f32
      %54 = vector.broadcast %cst_31 : f32 to vector<16x1xf32>
      %55 = arith.mulf %54, %53 : vector<16x1xf32>
      %c0_32 = arith.constant 0 : index
      %c0_33 = arith.constant 0 : index
      %56 = vector.load %arg5[%c0_32, %c0_33] : memref<16x1xf32, #tpu.memory_space<vmem>>, vector<16x1xf32>
      %c0_34 = arith.constant 0 : index
      %c0_35 = arith.constant 0 : index
      %57 = vector.load %arg6[%c0_34, %c0_35] : memref<16x1xf32, #tpu.memory_space<vmem>>, vector<16x1xf32>
      %cst_36 = arith.constant 6.400000e+01 : f32
      %58 = vector.broadcast %cst_36 : f32 to vector<16x1xf32>
      %59 = arith.mulf %58, %40 : vector<16x1xf32>
      %60 = arith.subf %59, %56 : vector<16x1xf32>
      %61 = math.exp %60 : vector<16x1xf32>
      %62 = arith.subf %57, %61 : vector<16x1xf32>
      %63 = arith.maximumf %55, %56 : vector<16x1xf32>
      %64 = arith.subf %55, %63 : vector<16x1xf32>
      %65 = math.exp %64 : vector<16x1xf32>
      %66 = arith.subf %56, %63 : vector<16x1xf32>
      %67 = math.exp %66 : vector<16x1xf32>
      %68 = arith.mulf %67, %62 : vector<16x1xf32>
      %69 = arith.addf %65, %68 : vector<16x1xf32>
      %70 = math.log %69 : vector<16x1xf32>
      %71 = arith.addf %63, %70 : vector<16x1xf32>
      %72 = arith.subf %55, %71 : vector<16x1xf32>
      %c0_37 = arith.constant 0 : index
      %c0_38 = arith.constant 0 : index
      %73 = vector.load %arg4[%c0_37, %c0_38] : memref<16x1xf32, #tpu.memory_space<vmem>>, vector<16x1xf32>
      tpu.vector_store %arg4[%c0_37, %c0_38], %72 {strides = array<i32>} : memref<16x1xf32, #tpu.memory_space<vmem>>, vector<16x1xf32>,
    } else {
    }
    return
  }
  func.func @transform_0(%arg0: i32, %arg1: i32) -> (i32, i32) {
    %c0_i32 = arith.constant 0 : i32
    %c0_i32_0 = arith.constant 0 : i32
    return %arg0, %c0_i32 : i32, i32
  }
  func.func @transform_1(%arg0: i32, %arg1: i32) -> (i32, i32) {
    %c0_i32 = arith.constant 0 : i32
    return %arg0, %arg1 : i32, i32
  }
  func.func @transform_2(%arg0: i32, %arg1: i32) -> (i32, i32) {
    %c0_i32 = arith.constant 0 : i32
    %c0_i32_0 = arith.constant 0 : i32
    return %arg0, %c0_i32 : i32, i32
  }
}

</mosaic_0001>

<bundles_post_ra>
// kernel: tpu_custom_call.1
= control target key start
LH: loop header
LB: loop body
LE: loop exit
PB: predicated region body
PF: predicated region fallthrough
CT: control target
= control target key end

     0   :  { %7 = vsyncpa [#allocation6], 0  ;;  %s306_s9 = smov [#allocation5]   ;;  %s409_s0 = inlined_call_operand.vmem [shape: s32[16,1], index: 0, kind: input, shape index: {}]   ;;  %s410_s1 = inlined_call_operand.hbm [shape: f32[16,384], index: 1, kind: input, shape index: {}]   ;;  %s411_s2 = inlined_call_operand.vmem [shape: f32[16,1], index: 2, kind: output, shape index: {}]  }
   0x1   :  { %s15_s10 = sshll.u32 %s306_s9, 4  ;;  %s16_s10 = int_to_ptr.vmem [resolvable:$true] %s15_s10 }
   0x2   :  { %s292_s11 = scalar_lea.vmem %s16_s10, 768  ;;  %p297_p1 = scmp.lt.s32.totalorder %s16_s10, %s16_s10 }
   0x3   :  { %p293_p0 = scmp.ne.s32.totalorder %s16_s10, %s292_s11  ;;  %p298_p2 = scmp.lt.s32.totalorder %s292_s11, %s292_s11 }
   0x5   :  { %p299_p3 = por %p298_p2, %p297_p1 }
   0x7   :  { %p300_p4 = pnand %p299_p3, %p293_p0 }
   0x9   :  { %303 = shalt.err (!%p300_p4)
}
   0xa   :  { %s307_s12 = smov 384   ;;  %s308_s13 = smov 24  }
   0xb   :  { %21 = dma.hbm_to_vmem [thread:$0]  %s410_s1, 768, %s16_s10, [#allocation6], %s307_s12, %s307_s12, %s308_s13  }
   0xc   :  { %304 = dma.done.wait [#allocation6], 768  }
   0xd   :  { %305 = vsyncadd [#allocation6], 4294966528  ;;  %vm29_vm0 = vcmask 7168   ;;  %v309_v0 = vmov 0   ;;  %v310_v1 = vmov -inf   ;;  %v36_v2 = vld [vmem:[#allocation5] sm:$0xff]  ;;  %v44_v29 = vlaneseq }
   0xe   :  { %246 = vset.pattern.permute.xlu1 %v309_v0  ;;  %30 = vst.msk [vmem:[#allocation2] sm:$0xff] %vm29_vm0, %v310_v1  ;;  %31 = vst.msk [vmem:[#allocation2 + $0x8] sm:$0xff] %vm29_vm0, %v310_v1  ;;  %247 = vset.pattern.permute.xlu0 %v309_v0  ;;  %v37_v3 = vld [vmem:[#allocation5 + $0x8] sm:$0xff]  ;;  %v38_v4 = vld [vmem:[#allocation5 + $0x10] sm:$0xff]  ;;  %v332_v5 = vmul.f32 64.0, %v36_v2  ;;  %v311_v20 = vmov 0.0  }
   0xf   :  { %v334_v6 = vmul.f32 64.0, %v37_v3  ;;  %v336_v7 = vmul.f32 64.0, %v38_v4  ;;  %v39_v8 = vld [vmem:[#allocation5 + $0x18] sm:$0xff]  ;;  %v40_v9 = vld [vmem:[#allocation5 + $0x20] sm:$0xff]  ;;  %v41_v10 = vld [vmem:[#allocation5 + $0x28] sm:$0xff]  ;;  %34 = vst.msk [vmem:[#allocation4] sm:$0xff] %vm29_vm0, %v311_v20 }
  0x10   :  { %v338_v11 = vmul.f32 64.0, %v39_v8  ;;  %v340_v12 = vmul.f32 64.0, %v41_v10  ;;  %v42_v13 = vld [vmem:[%s409_s0] sm:$0xff]  ;;  %v347_v15 = vmul.f32 64.0, %v40_v9  ;;  %v43_v17 = vld [vmem:[%s409_s0 + $0x8] sm:$0xff]  ;;  %32 = vst.msk [vmem:[#allocation3] sm:$0xff] %vm29_vm0, %v311_v20 }
  0x11   :  { %v94_v14 = vmax.f32 %v332_v5, %v336_v7  ;;  %54 = vperm.xlu1 %246, %v42_v13   ;;  %33 = vst.msk [vmem:[#allocation3 + $0x8] sm:$0xff] %vm29_vm0, %v311_v20  ;;  %35 = vst.msk [vmem:[#allocation4 + $0x8] sm:$0xff] %vm29_vm0, %v311_v20  ;;  %v45_v30 = vand.u32 127, %v44_v29 }
  0x12   :  { %v98_v16 = vmax.f32 %v338_v11, %v340_v12 }
  0x13   :  { %v95_v18 = vmax.f32 %v94_v14, %v334_v6  ;;  %v46_v32 = vadd.s32 128, %v45_v30  ;;  %v47_v33 = vadd.s32 256, %v45_v30 }
  0x14   :  { %v99_v19 = vmax.f32 %v98_v16, %v347_v15 }
  0x15   :  { %96 = vmax.xlane.f32.xlu0 %v95_v18  ;;  %57 = vperm.xlu1 %246, %v43_v17   ;;  %v360_v21 = vld [vmem:[#allocation2] sm:$0xff]  ;;  %v365_v24 = vld [vmem:[#allocation2 + $0x8] sm:$0xff] }
  0x19   :  { %100 = vmax.xlane.f32.xlu0 %v99_v19 }
  0x8c   :  { %v55_v31 = vpop.permute.xlu1 %54 }
  0x8d   :  { %vm59_vm1 = vcmp.eq.s32.totalorder %v45_v30, %v55_v31  ;;  %vm60_vm2 = vcmp.eq.s32.totalorder %v46_v32, %v55_v31  ;;  %vm61_vm5 = vcmp.eq.s32.totalorder %v47_v33, %v55_v31 }
  0x8e   :  { %v67_v35 = vsel %vm59_vm1, %v36_v2, 0.0  ;;  %v68_v36 = vsel %vm60_vm2, %v37_v3, 0.0  ;;  %v69_v38 = vsel %vm61_vm5, %v38_v4, 0.0 }
  0x8f   :  { %v73_v37 = vadd.f32 %v68_v36, %v67_v35 }
  0x90   :  { %v58_v34 = vpop.permute.xlu1 %57 }
  0x91   :  { %vm62_vm3 = vcmp.eq.s32.totalorder %v45_v30, %v58_v34  ;;  %vm63_vm4 = vcmp.eq.s32.totalorder %v46_v32, %v58_v34  ;;  %vm64_vm6 = vcmp.eq.s32.totalorder %v47_v33, %v58_v34  ;;  %v74_v41 = vadd.f32 %v73_v37, %v69_v38 }
  0x92   :  { %v70_v39 = vsel %vm62_vm3, %v39_v8, 0.0  ;;  %v71_v40 = vsel %vm63_vm4, %v40_v9, 0.0  ;;  %v72_v43 = vsel %vm64_vm6, %v41_v10, 0.0  ;;  %v66_v8 = vld [vmem:[#allocation4 + $0x8] sm:$0xff] }
  0x93   :  { %v77_v42 = vadd.f32 %v71_v40, %v70_v39 }
  0x95   :  { %v78_v44 = vadd.f32 %v77_v42, %v72_v43 }
  0x9e   :  { %v97_v22 = vpop.xlane.xlu0 %96 }
  0x9f   :  { %v363_v23 = vmax.f32 %v360_v21, %v97_v22 }
  0xa1   :  { %v106_v25 = vsub.f32 %v360_v21, %v363_v23  ;;  %154 = vst.msk [vmem:[#allocation2] sm:$0xff] %vm29_vm0, %v363_v23  ;;  %116 = vperm.xlu0 %247, %v363_v23  }
  0xa2   :  { %v101_v26 = vpop.xlane.xlu0 %100 }
  0xa3   :  { %v373_v27 = vmax.f32 %v365_v24, %v101_v26  ;;  %v108_v37 = vmul.f32 1.442695, %v106_v25 }
  0xa5   :  { %v107_v28 = vsub.f32 %v365_v24, %v373_v27  ;;  %155 = vst.msk [vmem:[#allocation2 + $0x8] sm:$0xff] %vm29_vm0, %v373_v27  ;;  %121 = vperm.xlu1 %246, %v373_v27  }
  0xac   :  { %v192_v23 = vld [vmem:[#allocation2 + $0x8] sm:$0xff] }
  0xc9   :  { %75 = vadd.xlane.f32.xlu1 %v74_v41  ;;  %v110_v41 = vmul.f32 1.442695, %v107_v28 }
  0xcd   :  { %79 = vadd.xlane.f32.xlu1 %v78_v44 }
 0x11c   :  { %v117_v45 = vpop.permute.xlu0 %116 }
 0x11d   :  { %v124_v46 = vsub.f32 %v332_v5, %v117_v45  ;;  %v125_v47 = vsub.f32 %v334_v6, %v117_v45  ;;  %v126_v48 = vsub.f32 %v336_v7, %v117_v45  ;;  %v65_v5 = vld [vmem:[#allocation4] sm:$0xff] }
 0x11e   :  { %v191_v45 = vld [vmem:[#allocation2] sm:$0xff] }
 0x11f   :  { %v130_v49 = vmul.f32 1.442695, %v124_v46  ;;  %v132_v50 = vmul.f32 1.442695, %v125_v47  ;;  %v134_v51 = vmul.f32 1.442695, %v126_v48 }
 0x120   :  { %v122_v52 = vpop.permute.xlu1 %121 }
 0x121   :  { %248 = vpow2.f32 %v130_v49  ;;  %v127_v53 = vsub.f32 %v338_v11, %v122_v52  ;;  %v128_v54 = vsub.f32 %v347_v15, %v122_v52  ;;  %v129_v55 = vsub.f32 %v340_v12, %v122_v52 }
 0x122   :  { %250 = vpow2.f32 %v132_v50 }
 0x123   :  { %v136_v56 = vmul.f32 1.442695, %v127_v53  ;;  %v138_v57 = vmul.f32 1.442695, %v128_v54  ;;  %252 = vpow2.f32 %v134_v51  ;;  %v140_v58 = vmul.f32 1.442695, %v129_v55 }
 0x124   :  { %v104_v54 = vld [vmem:[#allocation3] sm:$0xff] }
 0x125   :  { %254 = vpow2.f32 %v136_v56 }
 0x126   :  { %256 = vpow2.f32 %v138_v57 }
 0x127   :  { %258 = vpow2.f32 %v140_v58 }
 0x12e   :  { %v249_v59 = vpop.eup %248 }
 0x12f   :  { %v251_v60 = vpop.eup %250 }
 0x130   :  { %v142_v61 = vadd.f32 %v251_v60, %v249_v59  ;;  %v253_v62 = vpop.eup %252 }
 0x132   :  { %v255_v63 = vpop.eup %254  ;;  %v143_v0 = vadd.f32 %v253_v62, %v142_v61  ;;  %v105_v61 = vld [vmem:[#allocation3 + $0x8] sm:$0xff] }
 0x133   :  { %v257_v1 = vpop.eup %256 }
 0x134   :  { %144 = vadd.xlane.f32.xlu0 %v143_v0  ;;  %v146_v2 = vadd.f32 %v257_v1, %v255_v63  ;;  %v259_v3 = vpop.eup %258 }
 0x136   :  { %v147_v4 = vadd.f32 %v259_v3, %v146_v2 }
 0x138   :  { %148 = vadd.xlane.f32.xlu1 %v147_v4 }
 0x152   :  { %v76_v6 = vpop.xlane.xlu1 %75 }
 0x153   :  { %v81_v7 = vadd.f32 %v76_v6, %v65_v5 }
 0x155   :  { %84 = vst.msk [vmem:[#allocation4] sm:$0xff] %vm29_vm0, %v81_v7 }
 0x156   :  { %v80_v9 = vpop.xlane.xlu1 %79 }
 0x157   :  { %v82_v10 = vadd.f32 %v80_v9, %v66_v8 }
 0x159   :  { %85 = vst.msk [vmem:[#allocation4 + $0x8] sm:$0xff] %vm29_vm0, %v82_v10 }
 0x15c   :  { %v159_v11 = vld [vmem:[#allocation4] sm:$0xff] }
 0x15d   :  { %v238_v12 = vclamps-f32 %v159_v11, 0.9999999  ;;  %v195_v44 = vmul.f32 64.0, %v159_v11 }
 0x15f   :  { %v167_v14 = vmul.f32 %v238_v12, %v238_v12  ;;  %v165_v34 = vmul.f32 0.87758255, %v238_v12  ;;  %v197_v21 = vsub.f32 %v195_v44, %v191_v45 }
 0x160   :  { %v160_v13 = vld [vmem:[#allocation4 + $0x8] sm:$0xff] }
 0x161   :  { %v239_v15 = vclamps-f32 %v160_v13, 0.9999999  ;;  %v169_v16 = vsub.f32 1.0, %v167_v14  ;;  %v196_v48 = vmul.f32 64.0, %v160_v13  ;;  %v199_v51 = vmul.f32 1.442695, %v197_v21 }
 0x163   :  { %v168_v17 = vmul.f32 %v239_v15, %v239_v15  ;;  %260 = vrsqrt.f32 %v169_v16  ;;  %vm173_vm7 = vcmp.eq.f32.partialorder %v169_v16, inf  ;;  %v176_v26 = vand.u32 2147483648, %v169_v16 }
 0x164   :  { %vm175_vm8 = vcmp.eq.f32.partialorder %v169_v16, 0.0  ;;  %v166_v39 = vmul.f32 0.87758255, %v239_v15  ;;  %v198_v50 = vsub.f32 %v196_v48, %v192_v23 }
 0x165   :  { %v170_v18 = vsub.f32 1.0, %v168_v17 }
 0x166   :  { %v201_v53 = vmul.f32 1.442695, %v198_v50 }
 0x167   :  { %262 = vrsqrt.f32 %v170_v18  ;;  %vm180_vm9 = vcmp.eq.f32.partialorder %v170_v18, inf  ;;  %v183_v32 = vand.u32 2147483648, %v170_v18  ;;  %vm182_vm10 = vcmp.eq.f32.partialorder %v170_v18, 0.0 }
 0x168   :  { %264 = vpow2.f32 %v108_v37 }
 0x169   :  { %266 = vpow2.f32 %v110_v41 }
 0x16a   :  { %268 = vpow2.f32 %v199_v51 }
 0x170   :  { %v261_v19 = vpop.eup %260 }
 0x171   :  { %v172_v20 = vmul.f32 %v261_v19, %v169_v16 }
 0x173   :  { %v174_v29 = vsel %vm173_vm7, %v169_v16, %v172_v20 }
 0x174   :  { %v263_v22 = vpop.eup %262  ;;  %v177_v31 = vsel %vm175_vm8, %v176_v26, %v174_v29 }
 0x175   :  { %v179_v30 = vmul.f32 %v263_v22, %v170_v18  ;;  %v185_v35 = vmul.f32 0.47942555, %v177_v31  ;;  %v265_v28 = vpop.eup %264 }
 0x176   :  { %v112_v58 = vmul.f32 %v265_v28, %v104_v54  ;;  %v267_v59 = vpop.eup %266 }
 0x177   :  { %v181_v33 = vsel %vm180_vm9, %v170_v18, %v179_v30  ;;  %v187_v38 = vsub.f32 %v165_v34, %v185_v35  ;;  %v113_v0 = vmul.f32 %v267_v59, %v105_v61  ;;  %v269_v3 = vpop.eup %268 }
 0x178   :  { %v184_v36 = vsel %vm182_vm10, %v183_v32, %v181_v33 }
 0x179   :  { %v186_v40 = vmul.f32 0.47942555, %v184_v36  ;;  %v394_v42 = vmul.f32 64.0, %v187_v38 }
 0x17b   :  { %v188_v43 = vsub.f32 %v166_v39, %v186_v40  ;;  %v205_v46 = vmax.f32 %v394_v42, %v191_v45 }
 0x17d   :  { %v190_v47 = vmul.f32 64.0, %v188_v43  ;;  %v213_v25 = vsub.f32 %v191_v45, %v205_v46  ;;  %v207_v52 = vsub.f32 %v394_v42, %v205_v46 }
 0x17f   :  { %v206_v49 = vmax.f32 %v190_v47, %v192_v23  ;;  %v215_v24 = vmul.f32 1.442695, %v213_v25  ;;  %v209_v55 = vmul.f32 1.442695, %v207_v52 }
 0x181   :  { %v214_v27 = vsub.f32 %v192_v23, %v206_v49  ;;  %v208_v56 = vsub.f32 %v190_v47, %v206_v49  ;;  %270 = vpow2.f32 %v215_v24 }
 0x182   :  { %272 = vpow2.f32 %v201_v53 }
 0x183   :  { %v217_v57 = vmul.f32 1.442695, %v214_v27  ;;  %274 = vpow2.f32 %v209_v55  ;;  %v211_v62 = vmul.f32 1.442695, %v208_v56 }
 0x185   :  { %276 = vpow2.f32 %v217_v57 }
 0x186   :  { %278 = vpow2.f32 %v211_v62 }
 0x18e   :  { %v271_v6 = vpop.eup %270 }
 0x18f   :  { %v273_v7 = vpop.eup %272 }
 0x190   :  { %v275_v9 = vpop.eup %274 }
 0x192   :  { %v277_v13 = vpop.eup %276 }
 0x193   :  { %v279_v15 = vpop.eup %278 }
 0x1bd   :  { %v145_v60 = vpop.xlane.xlu0 %144 }
 0x1be   :  { %v150_v63 = vadd.f32 %v145_v60, %v112_v58 }
 0x1c0   :  { %152 = vst.msk [vmem:[#allocation3] sm:$0xff] %vm29_vm0, %v150_v63 }
 0x1c1   :  { %v149_v1 = vpop.xlane.xlu1 %148 }
 0x1c2   :  { %v151_v2 = vadd.f32 %v149_v1, %v113_v0 }
 0x1c4   :  { %153 = vst.msk [vmem:[#allocation3 + $0x8] sm:$0xff] %vm29_vm0, %v151_v2 }
 0x1c7   :  { %v193_v4 = vld [vmem:[#allocation3] sm:$0xff] }
 0x1c8   :  { %v203_v5 = vsub.f32 %v193_v4, %v269_v3 }
 0x1ca   :  { %v219_v8 = vmul.f32 %v271_v6, %v203_v5 }
 0x1cb   :  { %v194_v10 = vld [vmem:[#allocation3 + $0x8] sm:$0xff] }
 0x1cc   :  { %v221_v11 = vadd.f32 %v275_v9, %v219_v8  ;;  %v204_v12 = vsub.f32 %v194_v10, %v273_v7 }
 0x1ce   :  { %280 = vlog2.f32 %v221_v11  ;;  %v220_v14 = vmul.f32 %v277_v13, %v204_v12 }
 0x1d0   :  { %v222_v16 = vadd.f32 %v279_v15, %v220_v14 }
 0x1d2   :  { %282 = vlog2.f32 %v222_v16 }
 0x1db   :  { %v281_v17 = vpop.eup %280 }
 0x1dc   :  { %v224_v18 = vmul.f32 0.6931472, %v281_v17 }
 0x1de   :  { %v227_v19 = vadd.f32 %v224_v18, %v205_v46 }
 0x1df   :  { %v283_v20 = vpop.eup %282 }
 0x1e0   :  { %v229_v22 = vsub.f32 %v394_v42, %v227_v19  ;;  %v226_v26 = vmul.f32 0.6931472, %v283_v20 }
 0x1e2   :  { %231 = vst.msk [vmem:[%s411_s2] sm:$0xff] %vm29_vm0, %v229_v22  ;;  %v228_v29 = vadd.f32 %v226_v26, %v206_v49 }
 0x1e4   :  { %v230_v30 = vsub.f32 %v190_v47, %v228_v29 }
 0x1e6   :  { %232 = vst.msk [vmem:[%s411_s2 + $0x8] sm:$0xff] %vm29_vm0, %v230_v30 }
 0x1e7   :  { %237 = vsyncpa [#allocation6], 1 }

</bundles_post_ra>
